<compile_context>
chip_gen: v7x
topology: tpu7x:2x2x1
jax: 0.10.0
libtpu: 0.0.40
codegen_flags: <defaults>
</compile_context>

<pallas_src>
import functools

import jax
import jax.numpy as jnp
from jax.experimental import pallas as pl
from jax.experimental.pallas import tpu as pltpu


_CHUNK_ROWS = 32          # inner-loop sublane rows per step (4 int32 vregs/slab)
_VMEM_BUDGET = 10 * 1024 * 1024   # double-buffered DMA footprint target (safe on v5e)


def _dice_tile_kernel(logits_ref, labels_ref, tp_ref, pc_ref, tc_ref,
                      *, total_pix, need_mask, chunk):
    """One (image, pixel-tile) grid step.

    logits_ref: (1, C, TILE_S, 128) float    labels_ref: (1, 1, TILE_S, 128) int
    outputs:    (1, 1, C, 128) int32 per-lane partial counts for this tile.
    """
    n_cls = logits_ref.shape[1]
    tile_s = logits_ref.shape[2]
    t = pl.program_id(1)

    def count_chunk(row0, rows):
        # Labels widened in-kernel (kept narrow through the DMA).
        lbl = labels_ref[0, 0, pl.ds(row0, rows), :].astype(jnp.int32)

        # Dense argmax over classes, first-max tie-break (strict >) == torch.max.
        best = logits_ref[0, 0, pl.ds(row0, rows), :]
        pred = jnp.zeros((rows, 128), jnp.int32)
        for c in range(1, n_cls):
            x = logits_ref[0, c, pl.ds(row0, rows), :]
            better = x > best
            best = jnp.where(better, x, best)
            pred = jnp.where(better, jnp.int32(c), pred)

        if need_mask:
            # Ragged tail: send invalid pixels (padded lanes / OOB block rows)
            # to the out-of-range class n_cls so no real class counts them.
            r_iota = jax.lax.broadcasted_iota(jnp.int32, (rows, 128), 0)
            l_iota = jax.lax.broadcasted_iota(jnp.int32, (rows, 128), 1)
            gpix = (t * tile_s + row0 + r_iota) * 128 + l_iota
            invalid = gpix >= total_pix
            pred = jnp.where(invalid, jnp.int32(n_cls), pred)
            lbl = jnp.where(invalid, jnp.int32(n_cls), lbl)

        agree = pred == lbl
        tp_rows, pc_rows, tc_rows = [], [], []
        for c in range(n_cls):
            is_p = pred == c
            is_t = lbl == c
            pc_rows.append(jnp.sum(is_p.astype(jnp.int32), axis=0, keepdims=True))
            tc_rows.append(jnp.sum(is_t.astype(jnp.int32), axis=0, keepdims=True))
            tp_rows.append(jnp.sum((is_t & agree).astype(jnp.int32),
                                   axis=0, keepdims=True))
        return (jnp.concatenate(tp_rows, axis=0),     # (C, 128)
                jnp.concatenate(pc_rows, axis=0),
                jnp.concatenate(tc_rows, axis=0))

    acc = tuple(jnp.zeros((n_cls, 128), jnp.int32) for _ in range(3))
    n_full = tile_s // chunk
    rem = tile_s - n_full * chunk

    if n_full > 0:
        def body(k, carry):
            row0 = pl.multiple_of(k * chunk, chunk)
            upd = count_chunk(row0, chunk)
            return tuple(a + u for a, u in zip(carry, upd))
        acc = jax.lax.fori_loop(0, n_full, body, acc, unroll=n_full <= 8)
    if rem > 0:
        upd = count_chunk(n_full * chunk, rem)
        acc = tuple(a + u for a, u in zip(acc, upd))

    tp_ref[...] = acc[0][None, None]
    pc_ref[...] = acc[1][None, None]
    tc_ref[...] = acc[2][None, None]


def _pick_tile_s(s, n_cls, logit_bytes, label_bytes):
    """Sublane rows per DMA block: as large as the VMEM budget allows.

    Returns either the full row count `s`, or a multiple of 32 (safe sublane
    tiling for f32/bf16 logits and int32/int16/int8 labels).
    """
    per_row = 2 * 128 * (n_cls * logit_bytes + label_bytes)   # double-buffered
    max_s = max(32, (_VMEM_BUDGET // per_row) // 32 * 32)
    # NOTE: for very large class counts this floor of 32 rows can exceed the
    # budget; such models would want class-axis tiling as well.
    if s <= max_s:
        return s
    t = max_s
    while t >= 32:            # prefer a divisor: no ragged tail, no mask ops
        if s % t == 0:
            return t
        t -= 32
    return max_s              # tail tile handled by in-kernel masking


def _dice_counts(logits, labels, total_pix, tile_s):
    """logits: (N, C, S, 128) float, labels: (N, 1, S, 128) int.

    Returns (tp, pc, tc), each (N, n_tiles, C, 128) int32 per-(image, tile)
    per-lane partial counts; the caller sums them.
    """
    n_img, n_cls, s, _ = logits.shape
    n_tiles = pl.cdiv(s, tile_s)
    need_mask = (n_tiles * tile_s * 128 != total_pix)

    kernel = functools.partial(_dice_tile_kernel, total_pix=total_pix,
                               need_mask=need_mask, chunk=_CHUNK_ROWS)

    out_sds = jax.ShapeDtypeStruct((n_img, n_tiles, n_cls, 128), jnp.int32)
    out_spec = pl.BlockSpec((1, 1, n_cls, 128), lambda b, t: (b, t, 0, 0))

    bytes_accessed = (logits.size * logits.dtype.itemsize
                      + labels.size * labels.dtype.itemsize
                      + 3 * n_img * n_tiles * n_cls * 128 * 4)
    cost = pl.CostEstimate(flops=int(logits.size) * 8, transcendentals=0,
                           bytes_accessed=int(bytes_accessed))

    return pl.pallas_call(
        kernel,
        out_shape=(out_sds, out_sds, out_sds),
        grid_spec=pltpu.PrefetchScalarGridSpec(
            num_scalar_prefetch=0,
            grid=(n_img, n_tiles),
            in_specs=[
                pl.BlockSpec((1, n_cls, tile_s, 128), lambda b, t: (b, 0, t, 0)),
                pl.BlockSpec((1, 1, tile_s, 128), lambda b, t: (b, 0, t, 0)),
            ],
            out_specs=[out_spec, out_spec, out_spec],
        ),
        compiler_params=pltpu.CompilerParams(
            dimension_semantics=("parallel", "parallel")),
        cost_estimate=cost,
    )(logits, labels)


@jax.jit
def segmentation_dice_coefficient_dual(true_masks, out):
    """true_masks: (B, 2, H, W) int, out: (B, 2, C, H, W) float -> dice[1:]."""
    b, v, n_cls, h, w = out.shape
    n_img = b * v
    p = h * w
    s = pl.cdiv(p, 128)

    # Dual "concatenate views along batch" == plain contiguous reshape, because
    # the kernel only computes order-independent global sums.
    logits = out.reshape(n_img, n_cls, p)
    if (not jnp.issubdtype(true_masks.dtype, jnp.integer)
            or true_masks.dtype.itemsize > 4):
        true_masks = true_masks.astype(jnp.int32)
    labels = true_masks.reshape(n_img, 1, p)

    if s * 128 != p:
        # TODO(synk): in-kernel masking makes the padded pixels semantically
        # inert, but the 128-lane-alignment reshape below still needs this
        # (whole-tensor) pad copy when H*W is not a multiple of 128.
        logits = jnp.pad(logits, ((0, 0), (0, 0), (0, s * 128 - p)))
        labels = jnp.pad(labels, ((0, 0), (0, 0), (0, s * 128 - p)))
    logits = logits.reshape(n_img, n_cls, s, 128)
    labels = labels.reshape(n_img, 1, s, 128)

    tile_s = _pick_tile_s(s, n_cls, logits.dtype.itemsize, labels.dtype.itemsize)
    tp, pc, tc = _dice_counts(logits, labels, p, tile_s)

    # Tiny epilogue reduce in plain JAX: (N, n_tiles, C, 128) -> (C,)
    tp = jnp.sum(tp, axis=(0, 1, 3)).astype(jnp.float32)
    pc = jnp.sum(pc, axis=(0, 1, 3)).astype(jnp.float32)
    tc = jnp.sum(tc, axis=(0, 1, 3)).astype(jnp.float32)

    dice = 2.0 * tp / (pc + tc)   # NaN if a class never appears (matches ref)
    return dice[1:]               # drop background class 0


def _reference(true_masks, out):
    true_cat = jnp.concatenate([true_masks[:, 0], true_masks[:, 1]], axis=0)
    out_cat = jnp.concatenate([out[:, 0], out[:, 1]], axis=0)
    c = out_cat.shape[1]
    logits = jnp.transpose(out_cat, (0, 2, 3, 1)).reshape(-1, c)
    labels = true_cat.reshape(-1).astype(jnp.int32)
    pred = jnp.argmax(logits, axis=1)
    dices = []
    for cls in range(1, c):
        tp = jnp.sum((pred == cls) & (labels == cls)).astype(jnp.float32)
        div = (jnp.sum(pred == cls) + jnp.sum(labels == cls)).astype(jnp.float32)
        dices.append(2.0 * tp / div)
    return jnp.stack(dices)


if __name__ == "__main__":
    key = jax.random.PRNGKey(0)

    def run_case(b, v, c, h, w, k):
        k1, k2 = jax.random.split(k)
        out = jax.random.normal(k1, (b, v, c, h, w), dtype=jnp.float32)
        true_masks = jax.random.randint(k2, (b, v, h, w), 0, c, dtype=jnp.int32)
        got = jax.block_until_ready(
            segmentation_dice_coefficient_dual(true_masks, out))
        ref = jax.block_until_ready(_reference(true_masks, out))
        assert got.shape == (c - 1,), (got.shape, c)
        assert jnp.allclose(got, ref, atol=1e-6), (got, ref)

    keys = jax.random.split(key, 3)
    run_case(2, 2, 4, 16, 16, keys[0])   # primary small case (no mask, 1 chunk)
    run_case(1, 2, 3, 20, 20, keys[1])   # H*W % 128 != 0 -> in-kernel tail mask
    run_case(2, 2, 4, 80, 80, keys[2])   # inner chunk loop + remainder chunk

    print("KERNEL_OK")
</pallas_src>

<mosaic_0001>
module attributes {stable_mosaic.version = 11 : i64} {
  func.func @_dice_tile_kernel(%arg0: i32, %arg1: i32, %arg2: memref<1x4x2x128xf32, #tpu.memory_space<vmem>>, %arg3: memref<1x1x2x128xi32, #tpu.memory_space<vmem>>, %arg4: memref<1x1x4x128xi32, #tpu.memory_space<vmem>>, %arg5: memref<1x1x4x128xi32, #tpu.memory_space<vmem>>, %arg6: memref<1x1x4x128xi32, #tpu.memory_space<vmem>>) attributes {dimension_semantics = [#tpu.dimension_semantics<parallel>, #tpu.dimension_semantics<parallel>], iteration_bounds = array<i64: 4, 1>, scalar_prefetch = 0 : i64, scratch_operands = 0 : i64, tpu.core_type = #tpu.core_type<tc>, window_params = [{transform_indices = @transform_0, window_bounds = array<i64: 1, 4, 2, 128>}, {transform_indices = @transform_1, window_bounds = array<i64: 1, 1, 2, 128>}, {transform_indices = @transform_2, window_bounds = array<i64: 1, 1, 4, 128>}, {transform_indices = @transform_3, window_bounds = array<i64: 1, 1, 4, 128>}, {transform_indices = @transform_4, window_bounds = array<i64: 1, 1, 4, 128>}]} {
    %c0_i32 = arith.constant 0 : i32
    %0 = vector.broadcast %c0_i32 : i32 to vector<4x128xi32>
    %c0_i32_0 = arith.constant 0 : i32
    %1 = vector.broadcast %c0_i32_0 : i32 to vector<4x128xi32>
    %c0_i32_1 = arith.constant 0 : i32
    %2 = vector.broadcast %c0_i32_1 : i32 to vector<4x128xi32>
    %c0 = arith.constant 0 : index
    %c0_2 = arith.constant 0 : index
    %c0_3 = arith.constant 0 : index
    %c0_4 = arith.constant 0 : index
    %3 = vector.load %arg3[%c0, %c0_2, %c0_3, %c0_4] : memref<1x1x2x128xi32, #tpu.memory_space<vmem>>, vector<1x1x2x128xi32>
    %4 = vector.shape_cast %3 : vector<1x1x2x128xi32> to vector<2x128xi32>
    %c0_5 = arith.constant 0 : index
    %c0_6 = arith.constant 0 : index
    %c0_7 = arith.constant 0 : index
    %c0_8 = arith.constant 0 : index
    %5 = vector.load %arg2[%c0_5, %c0_6, %c0_7, %c0_8] : memref<1x4x2x128xf32, #tpu.memory_space<vmem>>, vector<1x1x2x128xf32>
    %6 = vector.shape_cast %5 : vector<1x1x2x128xf32> to vector<2x128xf32>
    %c0_i32_9 = arith.constant 0 : i32
    %7 = vector.broadcast %c0_i32_9 : i32 to vector<2x128xi32>
    %c0_10 = arith.constant 0 : index
    %c1 = arith.constant 1 : index
    %c0_11 = arith.constant 0 : index
    %c0_12 = arith.constant 0 : index
    %8 = vector.load %arg2[%c0_10, %c1, %c0_11, %c0_12] : memref<1x4x2x128xf32, #tpu.memory_space<vmem>>, vector<1x1x2x128xf32>
    %9 = vector.shape_cast %8 : vector<1x1x2x128xf32> to vector<2x128xf32>
    %10 = arith.cmpf ogt, %9, %6 : vector<2x128xf32>
    %11 = arith.select %10, %9, %6 : vector<2x128xi1>, vector<2x128xf32>
    %c1_i32 = arith.constant 1 : i32
    %12 = vector.broadcast %c1_i32 : i32 to vector<2x128xi32>
    %13 = arith.select %10, %12, %7 : vector<2x128xi1>, vector<2x128xi32>
    %c0_13 = arith.constant 0 : index
    %c2 = arith.constant 2 : index
    %c0_14 = arith.constant 0 : index
    %c0_15 = arith.constant 0 : index
    %14 = vector.load %arg2[%c0_13, %c2, %c0_14, %c0_15] : memref<1x4x2x128xf32, #tpu.memory_space<vmem>>, vector<1x1x2x128xf32>
    %15 = vector.shape_cast %14 : vector<1x1x2x128xf32> to vector<2x128xf32>
    %16 = arith.cmpf ogt, %15, %11 : vector<2x128xf32>
    %17 = arith.select %16, %15, %11 : vector<2x128xi1>, vector<2x128xf32>
    %c2_i32 = arith.constant 2 : i32
    %18 = vector.broadcast %c2_i32 : i32 to vector<2x128xi32>
    %19 = arith.select %16, %18, %13 : vector<2x128xi1>, vector<2x128xi32>
    %c0_16 = arith.constant 0 : index
    %c3 = arith.constant 3 : index
    %c0_17 = arith.constant 0 : index
    %c0_18 = arith.constant 0 : index
    %20 = vector.load %arg2[%c0_16, %c3, %c0_17, %c0_18] : memref<1x4x2x128xf32, #tpu.memory_space<vmem>>, vector<1x1x2x128xf32>
    %21 = vector.shape_cast %20 : vector<1x1x2x128xf32> to vector<2x128xf32>
    %22 = arith.cmpf ogt, %21, %17 : vector<2x128xf32>
    %c3_i32 = arith.constant 3 : i32
    %23 = vector.broadcast %c3_i32 : i32 to vector<2x128xi32>
    %24 = arith.select %22, %23, %19 : vector<2x128xi1>, vector<2x128xi32>
    %25 = arith.cmpi eq, %24, %4 : vector<2x128xi32>
    %c0_i32_19 = arith.constant 0 : i32
    %26 = vector.broadcast %c0_i32_19 : i32 to vector<2x128xi32>
    %27 = arith.cmpi eq, %24, %26 : vector<2x128xi32>
    %c0_i32_20 = arith.constant 0 : i32
    %28 = vector.broadcast %c0_i32_20 : i32 to vector<2x128xi32>
    %29 = arith.cmpi eq, %4, %28 : vector<2x128xi32>
    %30 = arith.extui %27 : vector<2x128xi1> to vector<2x128xi32>
    %cst = arith.constant dense<0> : vector<128xi32>
    %31 = vector.multi_reduction <add>, %30, %cst [0] : vector<2x128xi32> to vector<128xi32>
    %32 = vector.shape_cast %31 : vector<128xi32> to vector<1x128xi32>
    %33 = arith.extui %29 : vector<2x128xi1> to vector<2x128xi32>
    %cst_21 = arith.constant dense<0> : vector<128xi32>
    %34 = vector.multi_reduction <add>, %33, %cst_21 [0] : vector<2x128xi32> to vector<128xi32>
    %35 = vector.shape_cast %34 : vector<128xi32> to vector<1x128xi32>
    %36 = arith.andi %29, %25 : vector<2x128xi1>
    %37 = arith.extui %36 : vector<2x128xi1> to vector<2x128xi32>
    %cst_22 = arith.constant dense<0> : vector<128xi32>
    %38 = vector.multi_reduction <add>, %37, %cst_22 [0] : vector<2x128xi32> to vector<128xi32>
    %39 = vector.shape_cast %38 : vector<128xi32> to vector<1x128xi32>
    %c1_i32_23 = arith.constant 1 : i32
    %40 = vector.broadcast %c1_i32_23 : i32 to vector<2x128xi32>
    %41 = arith.cmpi eq, %24, %40 : vector<2x128xi32>
    %c1_i32_24 = arith.constant 1 : i32
    %42 = vector.broadcast %c1_i32_24 : i32 to vector<2x128xi32>
    %43 = arith.cmpi eq, %4, %42 : vector<2x128xi32>
    %44 = arith.extui %41 : vector<2x128xi1> to vector<2x128xi32>
    %cst_25 = arith.constant dense<0> : vector<128xi32>
    %45 = vector.multi_reduction <add>, %44, %cst_25 [0] : vector<2x128xi32> to vector<128xi32>
    %46 = vector.shape_cast %45 : vector<128xi32> to vector<1x128xi32>
    %47 = arith.extui %43 : vector<2x128xi1> to vector<2x128xi32>
    %cst_26 = arith.constant dense<0> : vector<128xi32>
    %48 = vector.multi_reduction <add>, %47, %cst_26 [0] : vector<2x128xi32> to vector<128xi32>
    %49 = vector.shape_cast %48 : vector<128xi32> to vector<1x128xi32>
    %50 = arith.andi %43, %25 : vector<2x128xi1>
    %51 = arith.extui %50 : vector<2x128xi1> to vector<2x128xi32>
    %cst_27 = arith.constant dense<0> : vector<128xi32>
    %52 = vector.multi_reduction <add>, %51, %cst_27 [0] : vector<2x128xi32> to vector<128xi32>
    %53 = vector.shape_cast %52 : vector<128xi32> to vector<1x128xi32>
    %c2_i32_28 = arith.constant 2 : i32
    %54 = vector.broadcast %c2_i32_28 : i32 to vector<2x128xi32>
    %55 = arith.cmpi eq, %24, %54 : vector<2x128xi32>
    %c2_i32_29 = arith.constant 2 : i32
    %56 = vector.broadcast %c2_i32_29 : i32 to vector<2x128xi32>
    %57 = arith.cmpi eq, %4, %56 : vector<2x128xi32>
    %58 = arith.extui %55 : vector<2x128xi1> to vector<2x128xi32>
    %cst_30 = arith.constant dense<0> : vector<128xi32>
    %59 = vector.multi_reduction <add>, %58, %cst_30 [0] : vector<2x128xi32> to vector<128xi32>
    %60 = vector.shape_cast %59 : vector<128xi32> to vector<1x128xi32>
    %61 = arith.extui %57 : vector<2x128xi1> to vector<2x128xi32>
    %cst_31 = arith.constant dense<0> : vector<128xi32>
    %62 = vector.multi_reduction <add>, %61, %cst_31 [0] : vector<2x128xi32> to vector<128xi32>
    %63 = vector.shape_cast %62 : vector<128xi32> to vector<1x128xi32>
    %64 = arith.andi %57, %25 : vector<2x128xi1>
    %65 = arith.extui %64 : vector<2x128xi1> to vector<2x128xi32>
    %cst_32 = arith.constant dense<0> : vector<128xi32>
    %66 = vector.multi_reduction <add>, %65, %cst_32 [0] : vector<2x128xi32> to vector<128xi32>
    %67 = vector.shape_cast %66 : vector<128xi32> to vector<1x128xi32>
    %c3_i32_33 = arith.constant 3 : i32
    %68 = vector.broadcast %c3_i32_33 : i32 to vector<2x128xi32>
    %69 = arith.cmpi eq, %24, %68 : vector<2x128xi32>
    %c3_i32_34 = arith.constant 3 : i32
    %70 = vector.broadcast %c3_i32_34 : i32 to vector<2x128xi32>
    %71 = arith.cmpi eq, %4, %70 : vector<2x128xi32>
    %72 = arith.extui %69 : vector<2x128xi1> to vector<2x128xi32>
    %cst_35 = arith.constant dense<0> : vector<128xi32>
    %73 = vector.multi_reduction <add>, %72, %cst_35 [0] : vector<2x128xi32> to vector<128xi32>
    %74 = vector.shape_cast %73 : vector<128xi32> to vector<1x128xi32>
    %75 = arith.extui %71 : vector<2x128xi1> to vector<2x128xi32>
    %cst_36 = arith.constant dense<0> : vector<128xi32>
    %76 = vector.multi_reduction <add>, %75, %cst_36 [0] : vector<2x128xi32> to vector<128xi32>
    %77 = vector.shape_cast %76 : vector<128xi32> to vector<1x128xi32>
    %78 = arith.andi %71, %25 : vector<2x128xi1>
    %79 = arith.extui %78 : vector<2x128xi1> to vector<2x128xi32>
    %cst_37 = arith.constant dense<0> : vector<128xi32>
    %80 = vector.multi_reduction <add>, %79, %cst_37 [0] : vector<2x128xi32> to vector<128xi32>
    %81 = vector.shape_cast %80 : vector<128xi32> to vector<1x128xi32>
    %82 = tpu.concatenate %39, %53, %67, %81 in 0 : vector<1x128xi32>, vector<1x128xi32>, vector<1x128xi32>, vector<1x128xi32> -> vector<4x128xi32>
    %83 = tpu.concatenate %32, %46, %60, %74 in 0 : vector<1x128xi32>, vector<1x128xi32>, vector<1x128xi32>, vector<1x128xi32> -> vector<4x128xi32>
    %84 = tpu.concatenate %35, %49, %63, %77 in 0 : vector<1x128xi32>, vector<1x128xi32>, vector<1x128xi32>, vector<1x128xi32> -> vector<4x128xi32>
    %85 = arith.addi %0, %82 : vector<4x128xi32>
    %86 = arith.addi %1, %83 : vector<4x128xi32>
    %87 = arith.addi %2, %84 : vector<4x128xi32>
    %88 = vector.shape_cast %85 : vector<4x128xi32> to vector<1x1x4x128xi32>
    %c0_38 = arith.constant 0 : index
    %c0_39 = arith.constant 0 : index
    %c0_40 = arith.constant 0 : index
    %c0_41 = arith.constant 0 : index
    %89 = vector.load %arg4[%c0_38, %c0_39, %c0_40, %c0_41] : memref<1x1x4x128xi32, #tpu.memory_space<vmem>>, vector<1x1x4x128xi32>
    tpu.vector_store %arg4[%c0_38, %c0_39, %c0_40, %c0_41], %88 {strides = array<i32>} : memref<1x1x4x128xi32, #tpu.memory_space<vmem>>, vector<1x1x4x128xi32>,
    %90 = vector.shape_cast %86 : vector<4x128xi32> to vector<1x1x4x128xi32>
    %c0_42 = arith.constant 0 : index
    %c0_43 = arith.constant 0 : index
    %c0_44 = arith.constant 0 : index
    %c0_45 = arith.constant 0 : index
    %91 = vector.load %arg5[%c0_42, %c0_43, %c0_44, %c0_45] : memref<1x1x4x128xi32, #tpu.memory_space<vmem>>, vector<1x1x4x128xi32>
    tpu.vector_store %arg5[%c0_42, %c0_43, %c0_44, %c0_45], %90 {strides = array<i32>} : memref<1x1x4x128xi32, #tpu.memory_space<vmem>>, vector<1x1x4x128xi32>,
    %92 = vector.shape_cast %87 : vector<4x128xi32> to vector<1x1x4x128xi32>
    %c0_46 = arith.constant 0 : index
    %c0_47 = arith.constant 0 : index
    %c0_48 = arith.constant 0 : index
    %c0_49 = arith.constant 0 : index
    %93 = vector.load %arg6[%c0_46, %c0_47, %c0_48, %c0_49] : memref<1x1x4x128xi32, #tpu.memory_space<vmem>>, vector<1x1x4x128xi32>
    tpu.vector_store %arg6[%c0_46, %c0_47, %c0_48, %c0_49], %92 {strides = array<i32>} : memref<1x1x4x128xi32, #tpu.memory_space<vmem>>, vector<1x1x4x128xi32>,
    return
  }
  func.func @transform_0(%arg0: i32, %arg1: i32) -> (i32, i32, i32, i32) {
    %c0_i32 = arith.constant 0 : i32
    %c0_i32_0 = arith.constant 0 : i32
    %c0_i32_1 = arith.constant 0 : i32
    return %arg0, %c0_i32, %arg1, %c0_i32_0 : i32, i32, i32, i32
  }
  func.func @transform_1(%arg0: i32, %arg1: i32) -> (i32, i32, i32, i32) {
    %c0_i32 = arith.constant 0 : i32
    %c0_i32_0 = arith.constant 0 : i32
    %c0_i32_1 = arith.constant 0 : i32
    return %arg0, %c0_i32, %arg1, %c0_i32_0 : i32, i32, i32, i32
  }
  func.func @transform_2(%arg0: i32, %arg1: i32) -> (i32, i32, i32, i32) {
    %c0_i32 = arith.constant 0 : i32
    %c0_i32_0 = arith.constant 0 : i32
    %c0_i32_1 = arith.constant 0 : i32
    return %arg0, %arg1, %c0_i32, %c0_i32_0 : i32, i32, i32, i32
  }
  func.func @transform_3(%arg0: i32, %arg1: i32) -> (i32, i32, i32, i32) {
    %c0_i32 = arith.constant 0 : i32
    %c0_i32_0 = arith.constant 0 : i32
    %c0_i32_1 = arith.constant 0 : i32
    return %arg0, %arg1, %c0_i32, %c0_i32_0 : i32, i32, i32, i32
  }
  func.func @transform_4(%arg0: i32, %arg1: i32) -> (i32, i32, i32, i32) {
    %c0_i32 = arith.constant 0 : i32
    %c0_i32_0 = arith.constant 0 : i32
    %c0_i32_1 = arith.constant 0 : i32
    return %arg0, %arg1, %c0_i32, %c0_i32_0 : i32, i32, i32, i32
  }
}

</mosaic_0001>

<bundles_post_ra>
// kernel: segmentation_dice_coefficient_dual.1
= control target key start
LH: loop header
LB: loop body
LE: loop exit
PB: predicated region body
PF: predicated region fallthrough
CT: control target
= control target key end

     0   :  { %s698_s15 = smov 0   ;;  %s700_s16 = smov 0   ;;  %s803_s0 = inlined_call_operand.vmem [shape: f32[4,4,2,128], index: 0, kind: input, shape index: {}]   ;;  %s804_s1 = inlined_call_operand.vmem [shape: s32[4,1,2,128], index: 1, kind: input, shape index: {}]   ;;  %s805_s2 = inlined_call_operand.vmem [shape: s32[4,1,4,128], index: 2, kind: output, shape index: {0}]   ;;  %s806_s3 = inlined_call_operand.vmem [shape: s32[4,1,4,128], index: 3, kind: output, shape index: {1}]   ;;  %s807_s4 = inlined_call_operand.vmem [shape: s32[4,1,4,128], index: 4, kind: output, shape index: {2}]  }
   0x1   :  { %s702_s17 = smov 0  }
   0x2 LB: > { %s27_s18 = sadd.s32 1, %s666_s16  ;;  %p610_p0 = scmp.ge.s32.totalorder %s670_s17, 1  ;;  %s670_s17 = sphi %s702_s17, %s15_s17   ;;  %s666_s16 = sphi %s700_s16, %s809_s16   ;;  %s662_s15 = sphi %s698_s15, %s808_s15  }
   0x3   : > { %p29_p1 = scmp.ge.s32.totalorder %s27_s18, 4  ;;  %p204_p2 = scmp.lt.s32.totalorder %s670_s17, 5 }
   0x5   : > { %s811_s18 = smov (%p29_p1, %s27_s18), 0  ;;  %p205_p3 = pnand %p610_p0, %p204_p2 }
   0x6   : > { %p256_p4 = scmp.lt.s32.totalorder (!%p205_p3), %s662_s15, 3  ;;  %vm312_vm0 = vcmask (!%p205_p3), 1041408   ;;  %v672_v5 = vmov (!%p205_p3), 0  }
   0x7   : > { %208 = sbr.rel (%p205_p3) target bundleno = 58 (0x3a), region = 28 }
   0xe   : > { %s813_s15 = smov (!%p256_p4, %s662_s15), 3 }
   0xf   : > { %s622_s19 = sshll.u32 %s813_s15, 3  ;;  %s613_s20 = sshll.u32 %s813_s15, 1 }
  0x10   : > { %s263_s23 = scalar_lea.vmem %s803_s0, %s622_s19  ;;  %s270_s26 = scalar_lea.vmem %s804_s1, %s613_s20 }
  0x11   : > { %v292_v0 = vld [vmem:[%s270_s26] sm:$0x3]  ;;  %v617_v2 = vld [vmem:[%s263_s23 + $0x2] sm:$0x3]  ;;  %v618_v3 = vld [vmem:[%s263_s23 + $0x4] sm:$0x3] }
  0x12   : > { %v293_v1 = vld [vmem:[%s263_s23] sm:$0x3]  ;;  %vm310_vm2 = vcmp.eq.s32.totalorder %v292_v0, 0  ;;  %vm338_vm3 = vcmp.eq.s32.totalorder %v292_v0, 1  ;;  %vm365_vm4 = vcmp.eq.s32.totalorder %v292_v0, 2  ;;  %vm392_vm5 = vcmp.eq.s32.totalorder %v292_v0, 3 }
  0x13   : > { %vm296_vm1 = vcmp.gt.f32.partialorder %v617_v2, %v293_v1  ;;  %v619_v7 = vld [vmem:[%s263_s23 + $0x6] sm:$0x3]  ;;  %v320_v8 = vsel %vm310_vm2, 1, %v672_v5  ;;  %v347_v10 = vsel %vm338_vm3, 1, %v672_v5  ;;  %v374_v11 = vsel %vm365_vm4, 1, %v672_v5  ;;  %s761_s27 = sshll.u32 %s813_s15, 2 }
  0x14   : > { %v297_v4 = vsel %vm296_vm1, %v617_v2, %v293_v1  ;;  %v298_v6 = vsel %vm296_vm1, 1, %v672_v5  ;;  %v321_v9 = vsel %vm312_vm0, %v320_v8, 0  ;;  %v731_v15 = vsel %vm312_vm0, %v347_v10, 0  ;;  %s277_s30 = scalar_lea.vmem %s805_s2, %s761_s27  ;;  %s284_s7 = scalar_lea.vmem %s806_s3, %s761_s27 }
  0x15   : > { %vm301_vm6 = vcmp.gt.f32.partialorder %v618_v3, %v297_v4  ;;  %v322_v14 = vrot.slane %v321_v9, 4  ;;  %v349_v16 = vrot.slane %v731_v15, 4  ;;  %v735_v17 = vsel %vm312_vm0, %v374_v11, 0  ;;  %s291_s10 = scalar_lea.vmem %s807_s4, %s761_s27 }
  0x16   : > { %v302_v12 = vsel %vm301_vm6, %v618_v3, %v297_v4  ;;  %v303_v13 = vsel %vm301_vm6, 2, %v298_v6  ;;  %v376_v20 = vrot.slane %v735_v17, 4  ;;  %v741_v21 = vsel %vm392_vm5, 1, %v672_v5 }
  0x17   : > { %vm306_vm7 = vcmp.gt.f32.partialorder %v619_v7, %v302_v12  ;;  %v737_v19 = vadd.s32 %v322_v14, %v321_v9 }
  0x18   : > { %v307_v18 = vsel %vm306_vm7, 3, %v303_v13 }
  0x19   : > { %vm308_vm8 = vcmp.eq.s32.totalorder %v307_v18, %v292_v0  ;;  %vm309_vm9 = vcmp.eq.s32.totalorder %v307_v18, 0  ;;  %vm337_vm10 = vcmp.eq.s32.totalorder %v307_v18, 1  ;;  %vm364_vm11 = vcmp.eq.s32.totalorder %v307_v18, 2 }
  0x1a   : > { %vm328_vm12 = vmand %vm310_vm2, %vm308_vm8  ;;  %v311_v22 = vsel %vm309_vm9, 1, %v672_v5  ;;  %v339_v23 = vsel %vm337_vm10, 1, %v672_v5  ;;  %v366_v24 = vsel %vm364_vm11, 1, %v672_v5  ;;  %vm391_vm13 = vcmp.eq.s32.totalorder %v307_v18, 3 }
  0x1b   : > { %v329_v25 = vsel %vm328_vm12, 1, %v672_v5  ;;  %vm355_vm14 = vmand %vm338_vm3, %vm308_vm8  ;;  %v313_v26 = vsel %vm312_vm0, %v311_v22, 0  ;;  %v340_v27 = vsel %vm312_vm0, %v339_v23, 0  ;;  %v367_v28 = vsel %vm312_vm0, %v366_v24, 0 }
  0x1c   : > { %v330_v29 = vsel %vm312_vm0, %v329_v25, 0  ;;  %v356_v30 = vsel %vm355_vm14, 1, %v672_v5  ;;  %vm382_vm15 = vmand %vm365_vm4, %vm308_vm8  ;;  %v314_v31 = vrot.slane %v313_v26, 4  ;;  %v341_v32 = vrot.slane %v340_v27, 4 }
  0x1d   : > { %v331_v33 = vrot.slane %v330_v29, 4  ;;  %v357_v34 = vsel %vm312_vm0, %v356_v30, 0  ;;  %v383_v35 = vsel %vm382_vm15, 1, %v672_v5  ;;  %vm409_vm1 = vmand %vm392_vm5, %vm308_vm8  ;;  %v368_v36 = vrot.slane %v367_v28, 4 }
  0x1e   : > { %v358_v37 = vrot.slane %v357_v34, 4  ;;  %v384_v38 = vsel %vm312_vm0, %v383_v35, 0  ;;  %v410_v39 = vsel %vm409_vm1, 1, %v672_v5  ;;  %v315_v40 = vadd.s32 %v314_v31, %v313_v26 }
  0x1f   : > { %v332_v41 = vadd.s32 %v331_v33, %v330_v29  ;;  %v385_v42 = vrot.slane %v384_v38, 4  ;;  %v411_v43 = vsel %vm312_vm0, %v410_v39, 0  ;;  %vm418_vm2 = vcmask 1040384  }
  0x20   : > { %v342_v44 = vadd.s32 %v341_v32, %v340_v27  ;;  %v359_v45 = vadd.s32 %v358_v37, %v357_v34  ;;  %v412_v46 = vrot.slane %v411_v43, 4  ;;  %v316_v47 = vrot.slane %v315_v40, 2 }
  0x21   : > { %v369_v48 = vadd.s32 %v368_v36, %v367_v28  ;;  %v333_v49 = vrot.slane %v332_v41, 2  ;;  %v386_v50 = vadd.s32 %v385_v42, %v384_v38  ;;  %vm421_vm3 = vcmask 1042432  }
  0x22   : > { %v343_v51 = vrot.slane %v342_v44, 2  ;;  %v393_v52 = vsel %vm391_vm13, 1, %v672_v5  ;;  %v360_v53 = vrot.slane %v359_v45, 2  ;;  %v413_v54 = vadd.s32 %v412_v46, %v411_v43 }
  0x23   : > { %v317_v55 = vadd.s32 %v316_v47, %v315_v40  ;;  %v370_v56 = vrot.slane %v369_v48, 2  ;;  %v334_v57 = vadd.s32 %v333_v49, %v332_v41  ;;  %v387_v58 = vrot.slane %v386_v50, 2 }
  0x24   : > { %v344_v59 = vadd.s32 %v343_v51, %v342_v44  ;;  %v394_v60 = vsel %vm312_vm0, %v393_v52, 0  ;;  %v361_v61 = vadd.s32 %v360_v53, %v359_v45  ;;  %v414_v62 = vrot.slane %v413_v54, 2 }
  0x25   : > { %v318_v63 = vrot.slane %v317_v55, 1  ;;  %v371_v0 = vadd.s32 %v370_v56, %v369_v48  ;;  %v335_v1 = vrot.slane %v334_v57, 1  ;;  %v388_v2 = vadd.s32 %v387_v58, %v386_v50 }
  0x26   : > { %v345_v3 = vrot.slane %v344_v59, 1  ;;  %v395_v4 = vrot.slane %v394_v60, 4  ;;  %v362_v6 = vrot.slane %v361_v61, 1  ;;  %v415_v5 = vadd.s32 %v414_v62, %v413_v54 }
  0x27   : > { %v319_v7 = vadd.s32 %v318_v63, %v317_v55  ;;  %v372_v8 = vrot.slane %v371_v0, 1  ;;  %v336_v9 = vadd.s32 %v335_v1, %v334_v57  ;;  %v389_v10 = vrot.slane %v388_v2, 1 }
  0x28   : > { %v346_v11 = vadd.s32 %v345_v3, %v344_v59  ;;  %v396_v12 = vadd.s32 %v395_v4, %v394_v60  ;;  %v363_v13 = vadd.s32 %v362_v6, %v361_v61  ;;  %v416_v14 = vrot.slane %v415_v5, 1 }
  0x29   : > { %v324_v18 = vrot.slane %v737_v19, 2  ;;  %v402_v22 = vsel %vm312_vm0, %v741_v21, 0  ;;  %v390_v23 = vadd.s32 %v389_v10, %v388_v2  ;;  %v373_v24 = vadd.s32 %v372_v8, %v371_v0 }
  0x2a   : > { %v397_v25 = vrot.slane %v396_v12, 2  ;;  %v350_v26 = vadd.s32 %v349_v16, %v731_v15  ;;  %v417_v27 = vadd.s32 %v416_v14, %v415_v5  ;;  %v419_v28 = vsel %vm418_vm2, %v336_v9, %v363_v13 }
  0x2b   : > { %v423_v29 = vsel %vm418_vm2, %v319_v7, %v346_v11  ;;  %v325_v30 = vadd.s32 %v324_v18, %v737_v19  ;;  %v420_v21 = vsel %vm312_vm0, %v419_v28, %v390_v23  ;;  %v377_v15 = vadd.s32 %v376_v20, %v735_v17 }
  0x2c   : > { %v398_v31 = vadd.s32 %v397_v25, %v396_v12  ;;  %v351_v32 = vrot.slane %v350_v26, 2  ;;  %v422_v16 = vsel %vm421_vm3, %v420_v21, %v417_v27  ;;  %v403_v34 = vrot.slane %v402_v22, 4 }
  0x2d   : > { %v326_v33 = vrot.slane %v325_v30, 1  ;;  %429 = vst [vmem:[%s277_s30] sm:$0xf] %v422_v16  ;;  %v378_v37 = vrot.slane %v377_v15, 2  ;;  %v424_v38 = vsel %vm312_vm0, %v423_v29, %v373_v24 }
  0x2e   : > { %v399_v35 = vrot.slane %v398_v31, 1  ;;  %v352_v36 = vadd.s32 %v351_v32, %v350_v26  ;;  %v404_v39 = vadd.s32 %v403_v34, %v402_v22 }
  0x2f   : > { %v327_v40 = vadd.s32 %v326_v33, %v325_v30  ;;  %v379_v17 = vadd.s32 %v378_v37, %v377_v15 }
  0x30   : > { %v400_v19 = vadd.s32 %v399_v35, %v398_v31  ;;  %v353_v41 = vrot.slane %v352_v36, 1  ;;  %v405_v20 = vrot.slane %v404_v39, 2 }
  0x31   : > { %v380_v44 = vrot.slane %v379_v17, 1 }
  0x32   : > { %v425_v42 = vsel %vm421_vm3, %v424_v38, %v400_v19  ;;  %v354_v43 = vadd.s32 %v353_v41, %v352_v36  ;;  %v406_v45 = vadd.s32 %v405_v20, %v404_v39 }
  0x33   : > { %430 = vst [vmem:[%s284_s7] sm:$0xf] %v425_v42  ;;  %v381_v46 = vadd.s32 %v380_v44, %v379_v17 }
  0x34   : > { %v426_v47 = vsel %vm418_vm2, %v327_v40, %v354_v43  ;;  %v407_v48 = vrot.slane %v406_v45, 1 }
  0x35   : > { %v427_v49 = vsel %vm312_vm0, %v426_v47, %v381_v46 }
  0x36   : > { %v408_v50 = vadd.s32 %v407_v48, %v406_v45 }
  0x38   : > { %v428_v51 = vsel %vm421_vm3, %v427_v49, %v408_v50 }
  0x39   : > { %431 = vst [vmem:[%s291_s10] sm:$0xf] %v428_v51 }
  0x3a PF: > { %s15_s17 = sadd.s32 1, %s670_s17   ;;  %s808_s15 = smov %s666_s16 }
  0x3b   : > { %p12_p5 = scmp.ge.s32.totalorder %s15_s17, 6   ;;  %s809_s16 = smov %s811_s18 }
  0x3d   :  { %14 = sbr.rel (!%p12_p5) target bundleno = 2 (0x2), region = 88 }

</bundles_post_ra>
